<compile_context>
chip_gen: v5e
topology: v5e:2x2
jax: 0.10.0
libtpu: 0.0.40
codegen_flags: <defaults>
</compile_context>

<pallas_src>
import functools
import math

import jax
import jax.numpy as jnp
from jax.experimental import pallas as pl
from jax.experimental.pallas import tpu as pltpu

LANE = 128
SUBLANE = 8
EPS = 1e-6
SQRT_EPS = math.sqrt(EPS)


def _round_up(n, m):
    return ((n + m - 1) // m) * m


# ----------------------------- activations --------------------------------
def _tanh_prime(x):
    t = jnp.tanh(x)
    return 1.0 - t * t


_ACTIVATIONS = {
    "tanh": jnp.tanh,
    "relu": lambda x: jnp.maximum(x, 0.0),
    "sigmoid": jax.nn.sigmoid,
    "leakyrelu": lambda x: jnp.where(x >= 0, x, 0.25 * x),
    "tanh_prime": _tanh_prime,
}
_ARCHITECTURES = {"inside": -1, "outside": 0, "bottleneck": 1}


# ------------------------- fused Euler-flow kernels -------------------------
# Grid axis 0 = Euler time step k (weights for step k streamed via index_map).
# The ODE state lives in the resident output block xT_ref for the whole solve;
# only the final state and the per-step projected trajectory reach HBM.

def _affine_flow_kernel(x0_ref, w_ref, b_ref, wp_ref, bp_ref,
                        xT_ref, proj_ref, *, act, inside, dt, ce):
    k = pl.program_id(0)

    @pl.when(k == 0)
    def _():
        xT_ref[...] = x0_ref[...]          # initialize resident accumulator

    x = xT_ref[...]
    w = w_ref[0]          # [P, P], pre-transposed: x @ w == x @ W.T
    b = b_ref[0]          # [1, P]
    if inside:            # out = act(x) @ W.T + b
        f = jnp.dot(act(x), w, preferred_element_type=jnp.float32) + b
    else:                 # out = act(x @ W.T + b)
        f = act(jnp.dot(x, w, preferred_element_type=jnp.float32) + b)

    x_new = x + dt * f    # forward Euler step
    xT_ref[...] = x_new   # stays resident; flushed to HBM once after last step

    p = (jnp.dot(x_new, wp_ref[...], preferred_element_type=jnp.float32)
         + bp_ref[...])
    if not ce:            # robNeuralODE applies tanh when not cross_entropy
        p = jnp.tanh(p)
    proj_ref[0] = p


def _bottleneck_flow_kernel(x0_ref, w1_ref, b1_ref, w2_ref, wp_ref, bp_ref,
                            xT_ref, proj_ref, *, act, dt, ce):
    k = pl.program_id(0)

    @pl.when(k == 0)
    def _():
        xT_ref[...] = x0_ref[...]

    x = xT_ref[...]
    w1 = w1_ref[0]        # [P_in, P_hid], pre-transposed
    b1 = b1_ref[0]        # [1, P_hid]   (already includes the +1.0 constant)
    w2 = w2_ref[0]        # [P_hid, P_in], pre-transposed

    z = jnp.dot(x, w1, preferred_element_type=jnp.float32)
    o1 = jnp.sqrt(act(z + b1) + EPS) - SQRT_EPS
    o2 = jnp.sqrt(act(-z + b1) + EPS) - SQRT_EPS
    f = jnp.dot(jnp.minimum(o1, o2), w2, preferred_element_type=jnp.float32)

    x_new = x + dt * f
    xT_ref[...] = x_new

    p = (jnp.dot(x_new, wp_ref[...], preferred_element_type=jnp.float32)
         + bp_ref[...])
    if not ce:
        p = jnp.tanh(p)
    proj_ref[0] = p


def _run_flow(kernel, x0p, weight_stacks, wp, bp, time_steps):
    """One pallas_call that runs all `time_steps` Euler steps."""
    Bp, P = x0p.shape
    Po = wp.shape[1]

    w_specs = [pl.BlockSpec((1,) + tuple(w.shape[1:]), lambda k: (k, 0, 0))
               for w in weight_stacks]

    return pl.pallas_call(
        kernel,
        out_shape=(
            jax.ShapeDtypeStruct((Bp, P), jnp.float32),               # x(T)
            jax.ShapeDtypeStruct((time_steps, Bp, Po), jnp.float32),  # proj traj
        ),
        grid_spec=pltpu.PrefetchScalarGridSpec(
            num_scalar_prefetch=0,
            grid=(time_steps,),
            in_specs=(
                [pl.BlockSpec((Bp, P), lambda k: (0, 0))]             # x0 (fetched once)
                + w_specs                                             # per-step weights
                + [pl.BlockSpec(tuple(wp.shape), lambda k: (0, 0)),   # projector W
                   pl.BlockSpec(tuple(bp.shape), lambda k: (0, 0))]   # projector b
            ),
            out_specs=[
                pl.BlockSpec((Bp, P), lambda k: (0, 0)),              # resident state
                pl.BlockSpec((1, Bp, Po), lambda k: (k, 0, 0)),       # per-step proj
            ],
        ),
        compiler_params=pltpu.CompilerParams(
            dimension_semantics=("arbitrary",)),   # sequential Euler dependence
    )(x0p, *weight_stacks, wp, bp)


# --------------------------------- module -----------------------------------
class RobNeuralODE:
    """JAX/Pallas port of robNeuralODE's core forward path (synthetic weights).

    forward(x) -> (pred, proj_traj, features) where
      features  = x(T)  (forward-Euler Semiflow of the Dynamics RHS)
      proj_traj = linear_layer(x_k) for each Euler step k (+ tanh if not CE)
      pred      = linear_layer(features) == proj_traj[-1]
    """
    # TODO(synk): fixed_projector branch (pickle.load at forward time) has no
    #             Pallas equivalent and is not implemented.
    # TODO(synk): adj_Dynamics adjoint trajectories (diag_embed JVP flows) are
    #             not implemented here.
    # TODO(synk): trajectory() returns per-Euler-step states, not torchdiffeq's
    #             linspace eval-time interpolation.

    def __init__(self, key, data_dim, hidden_dim, output_dim=2, augment_dim=0,
                 non_linearity="tanh", architecture="inside", T=10,
                 time_steps=10, cross_entropy=True):
        if non_linearity not in _ACTIVATIONS or architecture not in _ARCHITECTURES:
            raise ValueError("Activation function or architecture not found.")
        if output_dim == 1 and cross_entropy:
            raise ValueError("Incompatible output dimension with loss function.")
        self.data_dim = data_dim
        self.augment_dim = augment_dim
        self.input_dim = data_dim + augment_dim
        self.hidden_dim = hidden_dim
        self.output_dim = output_dim
        self.act = _ACTIVATIONS[non_linearity]
        self.architecture = _ARCHITECTURES[architecture]
        self.T = T
        self.time_steps = time_steps
        self.cross_entropy = cross_entropy

        # ODE state width: hidden for inside/outside, input_dim for bottleneck.
        self.state_dim = self.input_dim if self.architecture > 0 else hidden_dim
        self.P_state = _round_up(self.state_dim, LANE)
        self.P_hidden = _round_up(hidden_dim, LANE)
        self.P_out = _round_up(output_dim, LANE)

        def linear_init(k, out_f, in_f):
            # torch.nn.Linear default init: U(-1/sqrt(in_f), 1/sqrt(in_f))
            kw, kb = jax.random.split(k)
            bound = 1.0 / math.sqrt(in_f)
            w = jax.random.uniform(kw, (out_f, in_f), jnp.float32, -bound, bound)
            b = jax.random.uniform(kb, (out_f,), jnp.float32, -bound, bound)
            return w, b

        def pad3(a, r, c):  # pad stacked [T, r0, c0] -> [T, r, c] with zeros
            return jnp.pad(a, ((0, 0), (0, r - a.shape[1]), (0, c - a.shape[2])))

        def pad2(a, r, c):
            return jnp.pad(a, ((0, r - a.shape[0]), (0, c - a.shape[1])))

        keys = jax.random.split(key, 2 * time_steps + 1)

        if self.architecture > 0:  # bottleneck
            w1s, b1s, w2s = [], [], []
            for i in range(time_steps):
                w1, b1 = linear_init(keys[2 * i], hidden_dim, self.input_dim)
                w2, _ = linear_init(keys[2 * i + 1], self.input_dim, hidden_dim)
                w1s.append(w1); b1s.append(b1); w2s.append(w2)
            # Reference (torch layout, unpadded).
            self.w1 = jnp.stack(w1s)               # [T, hidden, input]
            self.b1 = jnp.stack(b1s)               # [T, hidden]
            self.w2 = jnp.stack(w2s)               # [T, input, hidden]
            # Kernel stacks: pre-transposed + lane-padded, +1.0 folded into b1.
            self.kw1 = pad3(jnp.swapaxes(self.w1, 1, 2), self.P_state, self.P_hidden)
            self.kb1 = pad3((self.b1 + 1.0)[:, None, :], 1, self.P_hidden)
            self.kw2 = pad3(jnp.swapaxes(self.w2, 1, 2), self.P_hidden, self.P_state)
        else:  # inside / outside
            ws, bs = [], []
            for i in range(time_steps):
                w, b = linear_init(keys[2 * i], hidden_dim, hidden_dim)
                ws.append(w); bs.append(b)
            self.w = jnp.stack(ws)                 # [T, hidden, hidden]
            self.b = jnp.stack(bs)                 # [T, hidden]
            self.kw = pad3(jnp.swapaxes(self.w, 1, 2), self.P_state, self.P_state)
            self.kb = pad3(self.b[:, None, :], 1, self.P_state)

        # Output projector (robNeuralODE.linear_layer).
        wp, bp = linear_init(keys[-1], output_dim, self.state_dim)
        self.wp = wp                               # [output_dim, state_dim]
        self.bp = bp                               # [output_dim]
        self.kwp = pad2(wp.T, self.P_state, self.P_out)         # [P_state, P_out]
        self.kbp = pad2(bp[None, :], 1, self.P_out)              # [1, P_out]

    def __call__(self, x):
        B, D = x.shape
        if D > self.state_dim:
            raise ValueError("input wider than ODE state")
        Bp = _round_up(max(B, SUBLANE), SUBLANE)
        dt = self.T / self.time_steps

        # Lane/sublane-dense, zero-padded initial state (also handles augment_dim).
        x0p = jnp.zeros((Bp, self.P_state), jnp.float32)
        x0p = x0p.at[:B, :D].set(x.astype(jnp.float32))

        if self.architecture < 1:
            kern = functools.partial(_affine_flow_kernel, act=self.act,
                                     inside=(self.architecture < 0), dt=dt,
                                     ce=self.cross_entropy)
            xT_p, proj_p = _run_flow(kern, x0p, (self.kw, self.kb),
                                     self.kwp, self.kbp, self.time_steps)
        else:
            kern = functools.partial(_bottleneck_flow_kernel, act=self.act, dt=dt,
                                     ce=self.cross_entropy)
            xT_p, proj_p = _run_flow(kern, x0p, (self.kw1, self.kb1, self.kw2),
                                     self.kwp, self.kbp, self.time_steps)

        features = xT_p[:B, :self.state_dim]
        proj_traj = proj_p[:, :B, :self.output_dim]
        pred = proj_traj[-1]
        return pred, proj_traj, features


# ---------------------------- reference (pure JAX) ---------------------------
def _reference_forward(m, x):
    dt = m.T / m.time_steps
    x = x.astype(jnp.float32)
    if x.shape[1] < m.state_dim:   # augment with zeros, like Semiflow
        x = jnp.concatenate(
            [x, jnp.zeros((x.shape[0], m.state_dim - x.shape[1]), jnp.float32)], 1)
    proj = []
    for k in range(m.time_steps):
        if m.architecture < 1:
            w, b = m.w[k], m.b[k]
            if m.architecture < 0:
                f = m.act(x) @ w.T + b
            else:
                f = m.act(x @ w.T + b)
        else:
            w1, b1, w2 = m.w1[k], m.b1[k], m.w2[k]
            z = x @ w1.T
            o1 = jnp.sqrt(m.act(z + 1.0 + b1) + EPS) - SQRT_EPS
            o2 = jnp.sqrt(m.act(-z + 1.0 + b1) + EPS) - SQRT_EPS
            f = jnp.minimum(o1, o2) @ w2.T
        x = x + dt * f
        p = x @ m.wp.T + m.bp
        if not m.cross_entropy:
            p = jnp.tanh(p)
        proj.append(p)
    return x, jnp.stack(proj)


def _close(a, b):
    return bool(jnp.allclose(a, b, atol=1e-3, rtol=1e-3))


# ----------------------------------- main ------------------------------------
if __name__ == "__main__":
    key = jax.random.PRNGKey(0)
    kp1, kp2, kp3, kp4, kx1, kx2 = jax.random.split(key, 6)

    batch, hidden_dim, data_dim = 8, 32, 16
    T, time_steps, output_dim = 10, 10, 2

    # 'inside' (tanh): state lives in hidden space [batch, hidden_dim].
    m_in = RobNeuralODE(kp1, data_dim=hidden_dim, hidden_dim=hidden_dim,
                        output_dim=output_dim, non_linearity="tanh",
                        architecture="inside", T=T, time_steps=time_steps)
    x_h = jax.random.normal(kx1, (batch, hidden_dim), jnp.float32)
    pred_i, ptraj_i, feat_i = m_in(x_h)
    jax.block_until_ready(pred_i)
    rfeat_i, rproj_i = _reference_forward(m_in, x_h)
    assert feat_i.shape == (batch, hidden_dim)
    assert ptraj_i.shape == (time_steps, batch, output_dim)
    assert _close(feat_i, rfeat_i) and _close(ptraj_i, rproj_i)
    assert _close(pred_i, rproj_i[-1])

    # 'outside' (tanh).
    m_out = RobNeuralODE(kp2, data_dim=hidden_dim, hidden_dim=hidden_dim,
                         output_dim=output_dim, non_linearity="tanh",
                         architecture="outside", T=T, time_steps=time_steps)
    pred_o, ptraj_o, feat_o = m_out(x_h)
    jax.block_until_ready(pred_o)
    rfeat_o, rproj_o = _reference_forward(m_out, x_h)
    assert _close(feat_o, rfeat_o) and _close(ptraj_o, rproj_o)

    # 'outside' with cross_entropy=False (tanh applied to projection in-kernel).
    m_oce = RobNeuralODE(kp4, data_dim=hidden_dim, hidden_dim=hidden_dim,
                         output_dim=output_dim, non_linearity="tanh",
                         architecture="outside", T=T, time_steps=time_steps,
                         cross_entropy=False)
    pred_c, ptraj_c, feat_c = m_oce(x_h)
    jax.block_until_ready(pred_c)
    rfeat_c, rproj_c = _reference_forward(m_oce, x_h)
    assert _close(feat_c, rfeat_c) and _close(ptraj_c, rproj_c)
    assert _close(pred_c, rproj_c[-1])

    # 'bottleneck' (sigmoid -> strictly positive, so sqrt is NaN-free; the
    # original module's sqrt(tanh(.)+1e-6) is NaN-prone by construction).
    m_bn = RobNeuralODE(kp3, data_dim=data_dim, hidden_dim=hidden_dim,
                        output_dim=output_dim, non_linearity="sigmoid",
                        architecture="bottleneck", T=T, time_steps=time_steps)
    x_d = jax.random.normal(kx2, (batch, data_dim), jnp.float32)
    pred_b, ptraj_b, feat_b = m_bn(x_d)
    jax.block_until_ready(pred_b)
    rfeat_b, rproj_b = _reference_forward(m_bn, x_d)
    assert feat_b.shape == (batch, data_dim)
    assert _close(feat_b, rfeat_b) and _close(ptraj_b, rproj_b)
    assert _close(pred_b, rproj_b[-1])

    print("KERNEL_OK")
</pallas_src>

<mosaic_0001>
module attributes {stable_mosaic.version = 11 : i64} {
  func.func @_affine_flow_kernel(%arg0: i32, %arg1: memref<8x128xf32, #tpu.memory_space<vmem>>, %arg2: memref<1x128x128xf32, #tpu.memory_space<vmem>>, %arg3: memref<1x1x128xf32, #tpu.memory_space<vmem>>, %arg4: memref<128x128xf32, #tpu.memory_space<vmem>>, %arg5: memref<1x128xf32, #tpu.memory_space<vmem>>, %arg6: memref<8x128xf32, #tpu.memory_space<vmem>>, %arg7: memref<1x8x128xf32, #tpu.memory_space<vmem>>) attributes {dimension_semantics = [#tpu.dimension_semantics<arbitrary>], iteration_bounds = array<i64: 10>, scalar_prefetch = 0 : i64, scratch_operands = 0 : i64, tpu.core_type = #tpu.core_type<tc>, window_params = [{pipeline_mode = #tpu.pipeline_mode<synchronous>, transform_indices = @transform_0, window_bounds = array<i64: 8, 128>}, {transform_indices = @transform_1, window_bounds = array<i64: 1, 128, 128>}, {transform_indices = @transform_2, window_bounds = array<i64: 1, 1, 128>}, {pipeline_mode = #tpu.pipeline_mode<synchronous>, transform_indices = @transform_3, window_bounds = array<i64: 128, 128>}, {pipeline_mode = #tpu.pipeline_mode<synchronous>, transform_indices = @transform_4, window_bounds = array<i64: 1, 128>}, {pipeline_mode = #tpu.pipeline_mode<synchronous>, transform_indices = @transform_5, window_bounds = array<i64: 8, 128>}, {transform_indices = @transform_6, window_bounds = array<i64: 1, 8, 128>}]} {
    %c0_i32 = arith.constant 0 : i32
    %0 = arith.cmpi eq, %arg0, %c0_i32 : i32
    %1 = arith.extui %0 : i1 to i32
    %c0_i32_0 = arith.constant 0 : i32
    %2 = arith.cmpi ne, %1, %c0_i32_0 : i32
    scf.if %2 {
      %c0_19 = arith.constant 0 : index
      %c0_20 = arith.constant 0 : index
      %24 = vector.load %arg1[%c0_19, %c0_20] : memref<8x128xf32, #tpu.memory_space<vmem>>, vector<8x128xf32>
      %c0_21 = arith.constant 0 : index
      %c0_22 = arith.constant 0 : index
      %25 = vector.load %arg6[%c0_21, %c0_22] : memref<8x128xf32, #tpu.memory_space<vmem>>, vector<8x128xf32>
      tpu.vector_store %arg6[%c0_21, %c0_22], %24 {strides = array<i32>} : memref<8x128xf32, #tpu.memory_space<vmem>>, vector<8x128xf32>,
    } else {
    }
    %c0 = arith.constant 0 : index
    %c0_1 = arith.constant 0 : index
    %3 = vector.load %arg6[%c0, %c0_1] : memref<8x128xf32, #tpu.memory_space<vmem>>, vector<8x128xf32>
    %c0_2 = arith.constant 0 : index
    %c0_3 = arith.constant 0 : index
    %c0_4 = arith.constant 0 : index
    %4 = vector.load %arg2[%c0_2, %c0_3, %c0_4] : memref<1x128x128xf32, #tpu.memory_space<vmem>>, vector<1x128x128xf32>
    %5 = vector.shape_cast %4 : vector<1x128x128xf32> to vector<128x128xf32>
    %c0_5 = arith.constant 0 : index
    %c0_6 = arith.constant 0 : index
    %c0_7 = arith.constant 0 : index
    %6 = vector.load %arg3[%c0_5, %c0_6, %c0_7] : memref<1x1x128xf32, #tpu.memory_space<vmem>>, vector<1x1x128xf32>
    %7 = vector.shape_cast %6 : vector<1x1x128xf32> to vector<1x128xf32>
    %8 = math.tanh %3 : vector<8x128xf32>
    %cst = arith.constant dense<0.000000e+00> : vector<8x128xf32>
    %9 = tpu.matmul %8, %5, %cst {dimension_numbers = #tpu.dot_dimension_numbers<[1], [0], [0], [1], [0, 0, 1, 1], [], []>} : vector<8x128xf32>, vector<128x128xf32>, vector<8x128xf32> -> vector<8x128xf32>
    %10 = vector.broadcast %7 : vector<1x128xf32> to vector<8x128xf32>
    %11 = arith.addf %9, %10 : vector<8x128xf32>
    %cst_8 = arith.constant 1.000000e+00 : f32
    %12 = vector.broadcast %cst_8 : f32 to vector<8x128xf32>
    %13 = arith.mulf %12, %11 : vector<8x128xf32>
    %14 = arith.addf %3, %13 : vector<8x128xf32>
    %c0_9 = arith.constant 0 : index
    %c0_10 = arith.constant 0 : index
    %15 = vector.load %arg6[%c0_9, %c0_10] : memref<8x128xf32, #tpu.memory_space<vmem>>, vector<8x128xf32>
    tpu.vector_store %arg6[%c0_9, %c0_10], %14 {strides = array<i32>} : memref<8x128xf32, #tpu.memory_space<vmem>>, vector<8x128xf32>,
    %c0_11 = arith.constant 0 : index
    %c0_12 = arith.constant 0 : index
    %16 = vector.load %arg4[%c0_11, %c0_12] : memref<128x128xf32, #tpu.memory_space<vmem>>, vector<128x128xf32>
    %cst_13 = arith.constant dense<0.000000e+00> : vector<8x128xf32>
    %17 = tpu.matmul %14, %16, %cst_13 {dimension_numbers = #tpu.dot_dimension_numbers<[1], [0], [0], [1], [0, 0, 1, 1], [], []>} : vector<8x128xf32>, vector<128x128xf32>, vector<8x128xf32> -> vector<8x128xf32>
    %c0_14 = arith.constant 0 : index
    %c0_15 = arith.constant 0 : index
    %18 = vector.load %arg5[%c0_14, %c0_15] : memref<1x128xf32, #tpu.memory_space<vmem>>, vector<1x128xf32>
    %19 = vector.broadcast %18 : vector<1x128xf32> to vector<8x128xf32>
    %20 = arith.addf %17, %19 : vector<8x128xf32>
    %c0_16 = arith.constant 0 : index
    %c0_17 = arith.constant 0 : index
    %c0_18 = arith.constant 0 : index
    %21 = vector.load %arg7[%c0_16, %c0_17, %c0_18] : memref<1x8x128xf32, #tpu.memory_space<vmem>>, vector<1x8x128xf32>
    %22 = vector.shape_cast %21 : vector<1x8x128xf32> to vector<8x128xf32>
    %23 = vector.shape_cast %20 : vector<8x128xf32> to vector<1x8x128xf32>
    tpu.vector_store %arg7[%c0_16, %c0_17, %c0_18], %23 {strides = array<i32>} : memref<1x8x128xf32, #tpu.memory_space<vmem>>, vector<1x8x128xf32>,
    return
  }
  func.func @transform_0(%arg0: i32) -> (i32, i32) {
    %c0_i32 = arith.constant 0 : i32
    %c0_i32_0 = arith.constant 0 : i32
    %c0_i32_1 = arith.constant 0 : i32
    return %c0_i32, %c0_i32_0 : i32, i32
  }
  func.func @transform_1(%arg0: i32) -> (i32, i32, i32) {
    %c0_i32 = arith.constant 0 : i32
    %c0_i32_0 = arith.constant 0 : i32
    %c0_i32_1 = arith.constant 0 : i32
    return %arg0, %c0_i32, %c0_i32_0 : i32, i32, i32
  }
  func.func @transform_2(%arg0: i32) -> (i32, i32, i32) {
    %c0_i32 = arith.constant 0 : i32
    %c0_i32_0 = arith.constant 0 : i32
    %c0_i32_1 = arith.constant 0 : i32
    return %arg0, %c0_i32, %c0_i32_0 : i32, i32, i32
  }
  func.func @transform_3(%arg0: i32) -> (i32, i32) {
    %c0_i32 = arith.constant 0 : i32
    %c0_i32_0 = arith.constant 0 : i32
    %c0_i32_1 = arith.constant 0 : i32
    return %c0_i32, %c0_i32_0 : i32, i32
  }
  func.func @transform_4(%arg0: i32) -> (i32, i32) {
    %c0_i32 = arith.constant 0 : i32
    %c0_i32_0 = arith.constant 0 : i32
    %c0_i32_1 = arith.constant 0 : i32
    return %c0_i32, %c0_i32_0 : i32, i32
  }
  func.func @transform_5(%arg0: i32) -> (i32, i32) {
    %c0_i32 = arith.constant 0 : i32
    %c0_i32_0 = arith.constant 0 : i32
    %c0_i32_1 = arith.constant 0 : i32
    return %c0_i32, %c0_i32_0 : i32, i32
  }
  func.func @transform_6(%arg0: i32) -> (i32, i32, i32) {
    %c0_i32 = arith.constant 0 : i32
    %c0_i32_0 = arith.constant 0 : i32
    %c0_i32_1 = arith.constant 0 : i32
    return %arg0, %c0_i32, %c0_i32_0 : i32, i32, i32
  }
}

</mosaic_0001>

<bundles_post_ra>
// kernel: tpu_custom_call.1
= control target key start
LH: loop header
LB: loop body
LE: loop exit
PB: predicated region body
PF: predicated region fallthrough
CT: control target
= control target key end

     0   :  { %s1173_s0 = inlined_call_operand.hbm [shape: f32[8,128], index: 0, kind: input, shape index: {}]   ;;  %s1174_s1 = inlined_call_operand.hbm [shape: f32[10,128,128], index: 1, kind: input, shape index: {}]   ;;  %s1175_s2 = inlined_call_operand.hbm [shape: f32[10,1,128], index: 2, kind: input, shape index: {}]   ;;  %s1176_s3 = inlined_call_operand.hbm [shape: f32[128,128], index: 3, kind: input, shape index: {}]   ;;  %s1177_s4 = inlined_call_operand.vmem [shape: f32[1,128], index: 4, kind: input, shape index: {}]   ;;  %s1178_s5 = inlined_call_operand.hbm [shape: f32[8,128], index: 5, kind: output, shape index: {0}]   ;;  %s1179_s6 = inlined_call_operand.hbm [shape: f32[10,8,128], index: 6, kind: output, shape index: {1}]  }
   0x1   :  { %1186 = sst [smem:[#allocation20_spill]] %s1173_s0 }
   0x2   :  { %1187 = sst [smem:[#allocation21_spill]] %s1174_s1 }
   0x3   :  { %1188 = sst [smem:[#allocation22_spill]] %s1176_s3 }
   0x4   :  { %12 = vsyncpa [#allocation3], 0 }
   0x5   :  { %13 = vsyncpa [#allocation6], 0 }
   0x6   :  { %15 = vsyncpa [#allocation6 + $0x1], 0 }
   0x7   :  { %16 = vsyncpa [#allocation9], 0 }
   0x8   :  { %17 = vsyncpa [#allocation4], 0 }
   0x9   :  { %18 = vsyncpa [#allocation12], 0 }
   0xa   :  { %20 = vsyncpa [#allocation12 + $0x1], 0  ;;  %s950_s21 = smov 0   ;;  %s952_s22 = smov 0  }
   0xb   :  { %s954_s23 = smov 0   ;;  %s956_s24 = smov 0  }
   0xc LB: > { %s971_s25 = sadd.s32 1, %s908_s24   ;;  %s54_s26 = sadd.s32 1, %s904_s23  ;;  %s908_s24 = sphi %s956_s24, %s1206_s24   ;;  %s904_s23 = sphi %s954_s23, %s1210_s23   ;;  %s900_s22 = sphi %s952_s22, %s1209_s22   ;;  %s896_s21 = sphi %s950_s21, %s1208_s21  }
   0xd   : > { %1189 = sst [smem:[#allocation18_spill]] %s971_s25  ;;  %s51_s27 = ssub.s32 %s908_s24, %s971_s25 }
   0xe   : > { %p61_p0 = scmp.ne.s32.totalorder %s904_s23, %s900_s22  ;;  %p52_p1 = scmp.eq.s32.totalorder %s51_s27, 0 }
   0xf   : > { %p62_p2 = scmp.eq.s32.totalorder %s908_s24, 0  ;;  %p635_p4 = scmp.lt.s32.totalorder %s908_s24, 10 }
  0x10   : > { %s980_s28 = scalar_select %p52_p1, %s904_s23, %s54_s26  }
  0x11   : > { %p63_p3 = por %p62_p2, %p61_p0  ;;  %s235_s29 = sand.u32 1, %s908_s24  }
  0x12   : > { %1190 = sst [smem:[#allocation19_spill]] %s980_s28  ;;  %s1180_s30 = sand.u32 1, %s904_s23  }
  0x13   : > { %s581_s7 = sshll.u32 %s1180_s30, 7  ;;  %s596_s8 = sshll.u32 %s908_s24, 7 }
  0x14   : > { %s1191_s1 = sld [smem:[#allocation21_spill]]  ;;  %s239_s13 = scalar_lea.vmem [#allocation5], %s581_s7 }
  0x15   : > { %s247_s14 = sshll.u32 %s239_s13, 4  ;;  %p994_p5 = pnand %p635_p4, %p63_p3  ;;  %s248_s14 = int_to_ptr.vmem [resolvable:$true] %s247_s14 }
  0x16   : > { %s999_s16 = sadd.s32 4294967295, %s908_s24   ;;  %s576_s17 = sadd.s32 4294967294, %s908_s24  }
  0x17   : > { %s1002_s18 = scalar_lea.sflag [#allocation6], %s235_s29  ;;  %p686_p7 = pneg %p994_p5 }
  0x1a   : > { %s244_s11 = scalar_lea.hbm %s1191_s1, %s596_s8  ;;  %s689_s7 = scalar_lea.hbm %s1191_s1, 1280 }
  0x1b   : > { %s245_s12 = sshll.u32 %s244_s11, 4  ;;  %s246_s12 = int_to_ptr.hbm [resolvable:$true] %s245_s12 }
  0x1c   : > { %s682_s19 = sshra.s32 %s246_s12, 4  ;;  %s683_s19 = int_to_ptr.hbm [resolvable:$true] %s682_s19 }
  0x1d   : > { %s684_s20 = scalar_lea.hbm %s683_s19, 128  ;;  %p690_p10 = scmp.lt.s32.totalorder %s683_s19, %s1191_s1 }
  0x1e   : > { %p685_p6 = scmp.ne.s32.totalorder %s683_s19, %s684_s20  ;;  %p691_p11 = scmp.lt.s32.totalorder %s689_s7, %s684_s20 }
  0x20   : > { %p687_p8 = pnand %p686_p7, %p685_p6  ;;  %p692_p12 = por %p691_p11, %p690_p10 }
  0x22   : > { %p688_p9 = pneg %p687_p8 }
  0x24   : > { %p693_p13 = pnand %p692_p12, %p688_p9 }
  0x26   : > { %696 = shalt.err (!%p693_p13)
}
  0x27   : > { %s1181_s29 = smov 128   ;;  %s1182_s10 = smov 8  }
  0x28   : > { %625 = dma.hbm_to_vmem [thread:$0]  (!%p994_p5), %s246_s12, 2048, %s248_s14, %s1002_s18, %s1181_s29, %s1181_s29, %s1182_s10  }
  0x29   : > { %p67_p1 = scmp.ne.s32.totalorder %s900_s22, %s896_s21  ;;  %p68_p2 = scmp.eq.s32.totalorder %s999_s16, 0 }
  0x2a   : > { %p1185_p3 = scmp.eq.s32.totalorder %s999_s16, 9  ;;  %p186_p4 = scmp.eq.s32.totalorder %s576_s17, 9 }
  0x2b   : > { %p1027_p6 = por %p68_p2, %p67_p1  ;;  %p577_p8 = scmp.ge.s32.totalorder %s908_s24, 1 }
  0x2c   : > { %p1037_p9 = por %p1185_p3, %p61_p0  ;;  %p1041_p10 = por %p186_p4, %p67_p1 }
  0x2d   : > { %p193_p11 = scmp.lt.s32.totalorder %s908_s24, 11  ;;  %s1196_s0 = sld [smem:[#allocation20_spill]] }
  0x2e   : > { %s912_s26 = smov [#allocation2]   ;;  %s1198_s3 = sld [smem:[#allocation22_spill]] }
  0x2f   : > { %p1050_p13 = pnand %p577_p8, %p193_p11  ;;  %s207_s27 = sshll.u32 %s912_s26, 4  ;;  %s208_s27 = int_to_ptr.vmem [resolvable:$true] %s207_s27 }
  0x30   : > { %s913_s12 = smov [#allocation8]   ;;  %s263_s10 = scalar_lea.hbm %s1175_s2, %s908_s24 }
  0x31   : > { %p615_p0 = pneg %p1050_p13  ;;  %s218_s14 = sshll.u32 %s913_s12, 4  ;;  %s219_s14 = int_to_ptr.vmem [resolvable:$true] %s218_s14 }
  0x32   : > { %s1199_s26 = smov 8   ;;  %s265_s7 = sshll.u32 %s263_s10, 4  ;;  %s266_s7 = int_to_ptr.hbm [resolvable:$true] %s265_s7 }
  0x33   : > { %s205_s17 = sshll.u32 %s1196_s0, 4  ;;  %p616_p1 = pnand %p615_p0, %p68_p2  ;;  %s206_s17 = int_to_ptr.hbm [resolvable:$true] %s205_s17 }
  0x34   : > { %s216_s9 = sshll.u32 %s1198_s3, 4  ;;  %s1200_s0 = smov 128   ;;  %s217_s9 = int_to_ptr.hbm [resolvable:$true] %s216_s9 }
  0x35   : > { %618 = dma.hbm_to_vmem [thread:$0]  (!%p616_p1), %s206_s17, 128, %s208_s27, [#allocation3]  }
  0x36   : > { %621 = dma.hbm_to_vmem [thread:$0]  (!%p616_p1), %s217_s9, 2048, %s219_s14, [#allocation9], %s1200_s0, %s1200_s0, %s1199_s26  }
  0x37   : > { %s1201_s8 = sand.u32 1, %s904_s23   ;;  %s772_s28 = sshra.s32 %s266_s7, 4  ;;  %s773_s28 = int_to_ptr.hbm [resolvable:$true] %s772_s28 }
  0x38   : > { %s260_s1 = scalar_lea.vmem [#allocation7], %s1201_s8  ;;  %s774_s25 = scalar_lea.hbm %s773_s28, 1 }
  0x39   : > { %s267_s3 = sshll.u32 %s260_s1, 4  ;;  %p775_p4 = scmp.ne.s32.totalorder %s773_s28, %s774_s25  ;;  %s268_s3 = int_to_ptr.vmem [resolvable:$true] %s267_s3 }
  0x3a   : > { %s779_s17 = scalar_lea.hbm %s1175_s2, 10  ;;  %p780_p0 = scmp.lt.s32.totalorder %s773_s28, %s1175_s2 }
  0x3b   : > { %p777_p8 = pnand %p775_p4, %p686_p7  ;;  %p781_p1 = scmp.lt.s32.totalorder %s779_s17, %s774_s25 }
  0x3d   : > { %p778_p11 = pneg %p777_p8  ;;  %p782_p3 = por %p781_p1, %p780_p0 }
  0x3f   : > { %p783_p12 = pnand %p782_p3, %p778_p11 }
  0x41   : > { %786 = shalt.err (!%p783_p12)
}
  0x42   : > { %628 = dma.hbm_to_vmem [thread:$0]  (!%p994_p5), %s266_s7, 16, %s268_s3, %s1002_s18  }
  0x43   : > { %276 = sbr.rel (%p1050_p13) target bundleno = 385 (0x181), region = 40 }
  0x48   : > { %875 = dma.done.wait (%p68_p2), [#allocation3], 128  }
  0x49   : > { %877 = vsyncadd (%p68_p2), [#allocation3], 4294967168  ;;  %s283_s1 = sand.u32 1, %s999_s16   ;;  %s1090_s25 = sand.u32 1, %s900_s22  }
  0x4a   : > { %s586_s28 = sshll.u32 %s1090_s25, 7  ;;  %s284_s15 = scalar_lea.sflag [#allocation6], %s283_s1 }
  0x4b   : > { %s1093_s10 = scalar_lea.vmem [#allocation5], %s586_s28 }
  0x4c   : > { %879 = dma.done.wait (%p1027_p6), %s284_s15, 2064  }
  0x4d   : > { %881 = vsyncadd (%p1027_p6), %s284_s15, 4294965232  ;;  %s296_s3 = scalar_lea.vmem [#allocation7], %s1090_s25 }
  0x4e   : > { %883 = dma.done.wait (%p68_p2), [#allocation9], 2048  }
  0x4f   : > { %885 = vsyncadd (%p68_p2), [#allocation9], 4294965248  ;;  %s588_s18 = sshll.u32 %s1090_s25, 3  ;;  %p1202_p5 = scmp.ne.s32.totalorder %s999_s16, 0 }
  0x50   : > { %s1105_s20 = scalar_lea.vmem [#allocation11], %s588_s18 }
  0x51   : > { %338 = sbr.rel (%p1202_p5) target bundleno = 88 (0x58), region = 60 }
  0x56   : > { %v339_v0 = vld [vmem:[#allocation2] sm:$0xff] }
  0x57   : > { %340 = vst [vmem:[#allocation10] sm:$0xff] %v339_v0 }
  0x58 PF: > { %v357_v1 = vld [vmem:[%s1093_s10 + $0x78] sm:$0xff]  ;;  %v356_v2 = vld [vmem:[%s1093_s10 + $0x70] sm:$0xff]  ;;  %v355_v3 = vld [vmem:[%s1093_s10 + $0x68] sm:$0xff]  ;;  %s914_s11 = smov [#allocation10]   ;;  %s439_s26 = sshll.u32 %s1178_s5, 4  ;;  %s440_s26 = int_to_ptr.hbm [resolvable:$true] %s439_s26 }
  0x59   : > { %363 = vmatpush.msra.mxu0 %v357_v1  ;;  %v354_v4 = vld [vmem:[%s1093_s10 + $0x60] sm:$0xff]  ;;  %v353_v6 = vld [vmem:[%s1093_s10 + $0x58] sm:$0xff]  ;;  %v398_v8 = vld [vmem:[#allocation8 + $0x68] sm:$0xff]  ;;  %s437_s9 = sshll.u32 %s914_s11, 4  ;;  %p1203_p7 = scmp.eq.s32.totalorder %s999_s16, 9  ;;  %s438_s9 = int_to_ptr.vmem [resolvable:$true] %s437_s9 }
  0x5a   : > { %v400_v5 = vld [vmem:[#allocation8 + $0x78] sm:$0xff]  ;;  %v399_v7 = vld [vmem:[#allocation8 + $0x70] sm:$0xff]  ;;  %v397_v10 = vld [vmem:[#allocation8 + $0x60] sm:$0xff]  ;;  %s592_s7 = sshll.u32 %s999_s16, 3  ;;  %s451_s0 = sshll.u32 %s1105_s20, 4  ;;  %s452_s0 = int_to_ptr.vmem [resolvable:$true] %s451_s0 }
  0x5b   : > { %364 = vmatpush.msra.mxu0 %v356_v2  ;;  %405 = vmatpush.msra.mxu1 %v400_v5  ;;  %v352_v9 = vld [vmem:[%s1093_s10 + $0x50] sm:$0xff]  ;;  %v351_v11 = vld [vmem:[%s1093_s10 + $0x48] sm:$0xff]  ;;  %v396_v12 = vld [vmem:[#allocation8 + $0x58] sm:$0xff]  ;;  %s449_s29 = scalar_lea.hbm %s1179_s6, %s592_s7  ;;  %s427_s28 = scalar_lea.sflag [#allocation12], %s1090_s25 }
  0x5c   : > { %v350_v13 = vld [vmem:[%s1093_s10 + $0x40] sm:$0xff]  ;;  %v395_v14 = vld [vmem:[#allocation8 + $0x50] sm:$0xff]  ;;  %v394_v16 = vld [vmem:[#allocation8 + $0x48] sm:$0xff]  ;;  %s453_s1 = sshll.u32 %s449_s29, 4  ;;  %s850_s11 = scalar_lea.hbm %s1179_s6, 80  ;;  %s454_s1 = int_to_ptr.hbm [resolvable:$true] %s453_s1 }
  0x5d   : > { %365 = vmatpush.msra.mxu0 %v355_v3  ;;  %406 = vmatpush.msra.mxu1 %v399_v7  ;;  %v349_v15 = vld [vmem:[%s1093_s10 + $0x38] sm:$0xff]  ;;  %v348_v17 = vld [vmem:[%s1093_s10 + $0x30] sm:$0xff]  ;;  %v393_v18 = vld [vmem:[#allocation8 + $0x40] sm:$0xff]  ;;  %s844_s15 = sshra.s32 %s454_s1, 4  ;;  %s845_s15 = int_to_ptr.hbm [resolvable:$true] %s844_s15 }
  0x5e   : > { %v347_v19 = vld [vmem:[%s1093_s10 + $0x28] sm:$0xff]  ;;  %v392_v20 = vld [vmem:[#allocation8 + $0x38] sm:$0xff]  ;;  %v391_v23 = vld [vmem:[#allocation8 + $0x30] sm:$0xff]  ;;  %p851_p12 = scmp.lt.s32.totalorder %s845_s15, %s1179_s6 }
  0x5f   : > { %366 = vmatpush.msra.mxu0 %v354_v4  ;;  %407 = vmatpush.msra.mxu1 %v398_v8  ;;  %v346_v21 = vld [vmem:[%s1093_s10 + $0x20] sm:$0xff]  ;;  %v345_v24 = vld [vmem:[%s1093_s10 + $0x18] sm:$0xff]  ;;  %v390_v25 = vld [vmem:[#allocation8 + $0x28] sm:$0xff] }
  0x60   : > { %v341_v22 = vld [vmem:[#allocation10] sm:$0xff]  ;;  %v344_v26 = vld [vmem:[%s1093_s10 + $0x10] sm:$0xff]  ;;  %v388_v29 = vld [vmem:[#allocation8 + $0x18] sm:$0xff] }
  0x61   : > { %367 = vmatpush.msra.mxu0 %v353_v6  ;;  %408 = vmatpush.msra.mxu1 %v397_v10  ;;  %680 = vtanh.f32 %v341_v22  ;;  %v389_v27 = vld [vmem:[#allocation8 + $0x20] sm:$0xff]  ;;  %v387_v32 = vld [vmem:[#allocation8 + $0x10] sm:$0xff]  ;;  %v386_v33 = vld [vmem:[#allocation8 + $0x8] sm:$0xff] }
  0x62   : > { %v343_v28 = vld [vmem:[%s1093_s10 + $0x8] sm:$0xff]  ;;  %v342_v30 = vld [vmem:[%s1093_s10] sm:$0xff]  ;;  %v678_v35 = vld [vmem:[%s296_s3] ss:$0 sm:$0xff]  ;;  %s846_s10 = scalar_lea.hbm %s845_s15, 8 }
  0x63   : > { %368 = vmatpush.msra.mxu0 %v352_v9  ;;  %409 = vmatpush.msra.mxu1 %v396_v12  ;;  %v385_v34 = vld [vmem:[#allocation8] sm:$0xff]  ;;  %v679_v39 = vld [vmem:[%s1177_s4] ss:$0 sm:$0xff]  ;;  %p847_p2 = scmp.ne.s32.totalorder %s845_s15, %s846_s10  ;;  %p852_p13 = scmp.lt.s32.totalorder %s850_s11, %s846_s10 }
  0x65   : > { %369 = vmatpush.msra.mxu0 %v351_v11  ;;  %410 = vmatpush.msra.mxu1 %v395_v14  ;;  %p848_p3 = pnand %p847_p2, %p1037_p9  ;;  %p853_p4 = por %p852_p13, %p851_p12 }
  0x67   : > { %370 = vmatpush.msra.mxu0 %v350_v13  ;;  %411 = vmatpush.msra.mxu1 %v394_v16  ;;  %v681_v31 = vpop.eup %680  ;;  %p849_p6 = pneg %p848_p3 }
  0x69   : > { %371 = vmatpush.msra.mxu0 %v349_v15  ;;  %412 = vmatpush.msra.mxu1 %v393_v18  ;;  %p854_p8 = pnand %p853_p4, %p849_p6 }
  0x6b   : > { %372 = vmatpush.msra.mxu0 %v348_v17  ;;  %413 = vmatpush.msra.mxu1 %v392_v20 }
  0x6d   : > { %373 = vmatpush.msra.mxu0 %v347_v19  ;;  %414 = vmatpush.msra.mxu1 %v391_v23 }
  0x6f   : > { %374 = vmatpush.msra.mxu0 %v346_v21  ;;  %415 = vmatpush.msra.mxu1 %v390_v25 }
  0x71   : > { %375 = vmatpush.msra.mxu0 %v345_v24  ;;  %416 = vmatpush.msra.mxu1 %v389_v27 }
  0x73   : > { %376 = vmatpush.msra.mxu0 %v344_v26  ;;  %417 = vmatpush.msra.mxu1 %v388_v29 }
  0x75   : > { %377 = vmatpush.msra.mxu0 %v343_v28  ;;  %418 = vmatpush.msra.mxu1 %v387_v32 }
  0x77   : > { %378 = vmatpush.msra.mxu0 %v342_v30  ;;  %419 = vmatpush.msra.mxu1 %v386_v33 }
  0x78   : > { %379 = vmatmul.f32.vlgmr.msra.gmra.mxu0 %v681_v31 }
  0x79   : > { %420 = vmatpush.msra.mxu1 %v385_v34 }
  0xf5   : > { %v380_v36 = vpop.f32.mrf.mxu0 }
  0xf6   : > { %v381_v37 = vadd.f32 %v678_v35, %v380_v36 }
  0xf8   : > { %v383_v38 = vadd.f32 %v381_v37, %v341_v22 }
  0xfa   : > { %421 = vmatmul.f32.vlgmr.msra.gmra.mxu1 %v383_v38  ;;  %384 = vst [vmem:[#allocation10] sm:$0xff] %v383_v38 }
  0xfb   : > { %610 = dma.vmem_to_hbm [thread:$0]  (%p1203_p7), %s438_s9, 128, %s440_s26, [#allocation4]  }
 0x177   : > { %v422_v40 = vpop.f32.mrf.mxu1 }
 0x178   : > { %v423_v41 = vadd.f32 %v679_v39, %v422_v40 }
 0x17a   : > { %425 = vst [vmem:[%s1105_s20] sm:$0xff] %v423_v41 }
 0x17b   : > { %857 = shalt.err (!%p854_p8)
}
 0x17c   : > { %611 = dma.vmem_to_hbm [thread:$0]  (%p1037_p9), %s452_s0, 128, %s454_s1, %s427_s28  }
 0x17d   : > { %p1204_p11 = pmov %p1203_p7 }
 0x17e   : > { %p1205_p0 = pmov %p1203_p7 }
 0x17f   : > { %887 = dma.done.wait (%p1204_p11), [#allocation4], 128  }
 0x180   : > { %889 = vsyncadd (%p1205_p0), [#allocation4], 4294967168 }
 0x181 PF: > { %p640_p1 = scmp.ge.s32.totalorder %s908_s24, 2  ;;  %s470_s25 = sand.u32 1, %s896_s21  }
 0x182   : > { %s471_s20 = scalar_lea.sflag [#allocation12], %s470_s25 }
 0x183   : > { %p630_p5 = pnand %p640_p1, %p1041_p10 }
 0x185   : > { %p631_p7 = pneg %p630_p5 }
 0x187   : > { %891 = dma.done.wait (%p631_p7), %s471_s20, 128  }
 0x188   : > { %893 = vsyncadd (%p631_p7), %s471_s20, 4294967168  ;;  %s1206_s24 = sld [smem:[#allocation18_spill]]  ;;  %s1208_s21 = smov %s900_s22 }
 0x189   : > { %s1207_s13 = sld [smem:[#allocation19_spill]]  ;;  %s1209_s22 = smov %s904_s23 }
 0x18e   : > { %p23_p9 = scmp.ge.s32.totalorder %s1206_s24, 12  }
 0x18f   : > { %s1210_s23 = smov %s1207_s13 }
 0x190   :  { %25 = sbr.rel (!%p23_p9) target bundleno = 12 (0xc), region = 118 }
 0x195   :  { %477 = vsyncpa [#allocation3], 1 }
 0x196   :  { %479 = vsyncpa [#allocation3 + $0x1], 1 }
 0x197   :  { %480 = vsyncpa [#allocation6], 1 }
 0x198   :  { %482 = vsyncpa [#allocation6 + $0x1], 1 }
 0x199   :  { %483 = vsyncpa [#allocation9], 1 }
 0x19a   :  { %484 = vsyncpa [#allocation4], 1 }
 0x19b   :  { %486 = vsyncpa [#allocation4 + $0x1], 1 }
 0x19c   :  { %487 = vsyncpa [#allocation12], 1 }
 0x19d   :  { %489 = vsyncpa [#allocation12 + $0x1], 1 }

</bundles_post_ra>
